<compile_context>
chip_gen: v7x
topology: tpu7x:2x2x1
jax: 0.10.0
libtpu: 0.0.40
codegen_flags: <defaults>
</compile_context>

<pallas_src>
import functools

import numpy as np
import jax
import jax.numpy as jnp
from jax.experimental import pallas as pl
from jax.experimental.pallas import tpu as pltpu

VMEM_SPEC = pl.BlockSpec(memory_space=pltpu.MemorySpace.VMEM)


def _softplus(x):
    # numerically-stable softplus built from primitives Mosaic lowers directly
    return jnp.maximum(x, 0.0) + jnp.log(1.0 + jnp.exp(-jnp.abs(x)))


# ------------------------------ fused kernel -------------------------------


def _tuned_fused_kernel(x_blk_ref, a_blk_ref, wcat_ref, wtail_ref, ce_ref,
                        evid_out_ref, agg_out_ref, *, meta, psi, ce_scale):
    V = meta["V"]
    C = meta["C"]
    D0 = meta["D0"]
    D1 = meta["D1"]
    off1 = meta["off1"]
    d1s = meta["d1s"]
    depths = meta["depths"]
    tails = meta["tails"]
    tail_rows = meta["tail_rows"]
    N = ce_ref.shape[1]
    f32 = jnp.float32

    X = x_blk_ref[...]            # (V*N, D0)  block-diagonal features
    A = a_blk_ref[...]            # (V*N, V*N) block-diagonal adjacency
    Wcat = wcat_ref[...]          # (D0+1, D1+D0+V*C)
    W = Wcat[:D0, :]
    b = Wcat[D0:D0 + 1, :]

    # ---------------- fused MLP layer-1 for all views ------------------------
    Hm1 = jnp.dot(X, W[:, :D1], preferred_element_type=f32) + b[:, :D1]

    # ---------------- fused 2-layer GCN for all views ------------------------
    W1g = W[:, D1:D1 + D0]
    b1g = b[:, D1:D1 + D0]
    W2g = W[:, D1 + D0:D1 + D0 + V * C]
    b2g = b[:, D1 + D0:D1 + D0 + V * C]

    # A_norm = D^{-1/2}(A+I)D^{-1/2}; A_norm @ Y = inv*(A@(inv*Y) + inv*Y).
    inv = jax.lax.rsqrt(jnp.sum(A, axis=1, keepdims=True) + 1.0)     # (V*N,1)
    P = inv * X
    T = inv * (jnp.dot(A, P, preferred_element_type=f32) + P)        # A_norm @ X
    H1 = jnp.dot(T, W1g, preferred_element_type=f32) + b1g           # gcn1 out
    # gcn2 reassociated: A_norm @ (H1 @ W2) + b2   (no inter-layer activation
    # in the reference GCN, so this is exact).
    Z = jnp.dot(H1, W2g, preferred_element_type=f32)                 # (V*N, V*C)
    Q = inv * Z
    G = inv * (jnp.dot(A, Q, preferred_element_type=f32) + Q) + b2g
    GCN = _softplus(G)                                               # (V*N, V*C)

    Wt = wtail_ref[...] if tail_rows > 0 else None
    ce = ce_ref[...]                                                 # (V, N, C)

    # ---------------- finish per-view evidence --------------------------------
    evid = []
    for v in range(V):
        r0 = v * N
        h = Hm1[r0:r0 + N, off1[v]:off1[v] + d1s[v]]
        if depths[v] == 1:
            ec = _softplus(h)                     # single-layer MLP ends here
        else:
            h = jnp.maximum(h, 0.0)               # ReLU (+Dropout as identity)
            n_tail = len(tails[v])
            for li, (din, dout, coff) in enumerate(tails[v]):
                w_l = Wt[:din, coff:coff + dout]
                b_l = Wt[tail_rows:tail_rows + 1, coff:coff + dout]
                h = jnp.dot(h, w_l, preferred_element_type=f32) + b_l
                if li < n_tail - 1:
                    h = jnp.maximum(h, 0.0)
                else:
                    h = _softplus(h)
            ec = h
        gcn_v = GCN[r0:r0 + N, v * C:(v + 1) * C]
        evid.append(ec + gcn_v + ce_scale * ce[v])

    # single whole-tile store of all views' evidences
    evid_out_ref[...] = jnp.stack(evid, axis=0)

    # ------------- complete graph: pairwise mean cosine similarity ------------
    # per-view norms hoisted out of the pair loop; each norm clamped separately
    # (matches F.cosine_similarity: dot / (max(||x||,1e-8) * max(||y||,1e-8))).
    en = []
    for v in range(V):
        sq = jnp.sum(evid[v] * evid[v], axis=1, keepdims=True)       # (N,1)
        en.append(evid[v] * jax.lax.rsqrt(jnp.maximum(sq, 1e-16)))

    sims = {}
    for i in range(V):
        for j in range(i + 1, V):
            row = jnp.sum(en[i] * en[j], axis=1, keepdims=True)      # (N,1)
            sims[(i, j)] = jnp.sum(row, axis=0, keepdims=True) * (1.0 / N)

    max_sim = None
    for s in sims.values():
        max_sim = s if max_sim is None else jnp.maximum(max_sim, s)
    thr = psi * max_sim
    # sub-threshold edges keep weight 0 but STAY in the per-view softmax,
    # exactly like the reference.
    w = {k: jnp.where(s > thr, s, jnp.zeros_like(s)) for k, s in sims.items()}

    # -------------------- MRF aggregation coefficients ------------------------
    coef = [None] * V

    def _acc(slot, val):
        coef[slot] = val if coef[slot] is None else coef[slot] + val

    for i in range(V):
        js = list(range(i + 1, V))
        if not js:
            continue
        # softmax over view i's outgoing edges sums to 1 => view i's own total
        # coefficient is exactly 1 (matches the reference accumulation).
        _acc(i, 1.0)
        if len(js) == 1:
            _acc(js[0], 1.0)                      # softmax of a single edge = 1
        else:
            # weights are cosines in [-1,1] or 0 -> shift-free softmax is safe
            # and identical (softmax is shift-invariant).
            exps = [jnp.exp(w[(i, j)]) for j in js]
            ssum = exps[0]
            for e in exps[1:]:
                ssum = ssum + e
            inv_s = pl.reciprocal(ssum, approx=True)
            for k, j in enumerate(js):
                _acc(j, exps[k] * inv_s)

    scale = 1.0 / (2.0 * V)
    acc = None
    for v in range(V):
        if coef[v] is None:
            continue
        term = (coef[v] * scale) * evid[v]
        acc = term if acc is None else acc + term
    if acc is None:
        acc = jnp.zeros((N, C), f32)
    agg_out_ref[...] = acc


# ------------------------------ model pieces -------------------------------


def _lin_init(key, fan_in, fan_out):
    kw, kb = jax.random.split(key)
    w = jax.random.normal(kw, (fan_in, fan_out), jnp.float32) * 0.1
    b = jax.random.normal(kb, (fan_out,), jnp.float32) * 0.01
    return w, b


def init_params(key, num_views, dims, num_classes):
    params = {"ec": [], "gcn": []}
    for v in range(num_views):
        d = dims[v]
        key, *ks = jax.random.split(key, len(d) + 1)
        layers = []
        for i in range(len(d) - 1):
            layers.append(_lin_init(ks[i], d[i], d[i + 1]))
        layers.append(_lin_init(ks[len(d) - 1], d[-1], num_classes))
        params["ec"].append(layers)
        key, k1, k2 = jax.random.split(key, 3)
        params["gcn"].append((_lin_init(k1, d[0], d[0]),
                              _lin_init(k2, d[0], num_classes)))
    params["alpha"] = jnp.ones((num_classes,), jnp.float32)
    return params


def pack_params(params, dims, num_classes):
    """Pack all per-view weights into two flat f32 buffers (runs once, eagerly)."""
    V = len(dims)
    C = num_classes
    d0s = [dims[v][0] for v in range(V)]
    d1s = [dims[v][1] if len(dims[v]) > 1 else C for v in range(V)]
    depths = [len(params["ec"][v]) for v in range(V)]
    D0, D1 = sum(d0s), sum(d1s)
    off0, off1 = [], []
    o = 0
    for d in d0s:
        off0.append(o)
        o += d
    o = 0
    for d in d1s:
        off1.append(o)
        o += d

    wtot = D1 + D0 + V * C
    wcat = np.zeros((D0 + 1, wtot), np.float32)
    for v in range(V):
        w0, b0 = params["ec"][v][0]
        wcat[off0[v]:off0[v] + d0s[v], off1[v]:off1[v] + d1s[v]] = np.asarray(w0)
        wcat[D0, off1[v]:off1[v] + d1s[v]] = np.asarray(b0)
        (g1w, g1b), (g2w, g2b) = params["gcn"][v]
        c0 = D1 + off0[v]
        wcat[off0[v]:off0[v] + d0s[v], c0:c0 + d0s[v]] = np.asarray(g1w)
        wcat[D0, c0:c0 + d0s[v]] = np.asarray(g1b)
        c1 = D1 + D0 + v * C
        wcat[off0[v]:off0[v] + d0s[v], c1:c1 + C] = np.asarray(g2w)
        wcat[D0, c1:c1 + C] = np.asarray(g2b)

    # remaining ("tail") MLP layers packed into one small buffer
    max_in, tot_out = 0, 0
    for v in range(V):
        for (w_l, _) in params["ec"][v][1:]:
            max_in = max(max_in, int(w_l.shape[0]))
            tot_out += int(w_l.shape[1])
    if tot_out == 0:
        wtail = np.zeros((1, 1), np.float32)
        tails = tuple(() for _ in range(V))
        tail_rows = 0
    else:
        wtail = np.zeros((max_in + 1, tot_out), np.float32)
        coff = 0
        tails = []
        for v in range(V):
            vt = []
            for (w_l, b_l) in params["ec"][v][1:]:
                din, dout = int(w_l.shape[0]), int(w_l.shape[1])
                wtail[:din, coff:coff + dout] = np.asarray(w_l)
                wtail[max_in, coff:coff + dout] = np.asarray(b_l)
                vt.append((din, dout, coff))
                coff += dout
            tails.append(tuple(vt))
        tails = tuple(tails)
        tail_rows = max_in

    meta = dict(V=V, C=C, D0=D0, D1=D1,
                d0s=tuple(d0s), d1s=tuple(d1s),
                off0=tuple(off0), off1=tuple(off1),
                depths=tuple(depths), tails=tails, tail_rows=tail_rows)
    return jnp.asarray(wcat), jnp.asarray(wtail), meta


def _block_diag(mats):
    rows = sum(m.shape[0] for m in mats)
    cols = sum(m.shape[1] for m in mats)
    out = jnp.zeros((rows, cols), jnp.float32)
    r = c = 0
    for m in mats:
        out = out.at[r:r + m.shape[0], c:c + m.shape[1]].set(m.astype(jnp.float32))
        r += m.shape[0]
        c += m.shape[1]
    return out


def tuned_forward(wcat, wtail, alpha, X_list, A_list, key, *, meta,
                  psi=0.7, ce_scale=0.1):
    V, C = meta["V"], meta["C"]
    D0, D1 = meta["D0"], meta["D1"]
    N = X_list[0].shape[0]
    VN = V * N

    # one batched Dirichlet draw for all views: (V, N, C)
    ce = jax.random.dirichlet(key, alpha, shape=(V, N)).astype(jnp.float32)

    X_blk = _block_diag(X_list)        # (V*N, D0)
    A_blk = _block_diag(A_list)        # (V*N, V*N)

    kernel = functools.partial(_tuned_fused_kernel, meta=meta, psi=psi,
                               ce_scale=ce_scale)

    tail_mm = sum(din * dout for vt in meta["tails"] for (din, dout, _) in vt)
    cost = pl.CostEstimate(
        flops=int(2 * VN * (D0 * D1 + VN * D0 + D0 * D0 + D0 * V * C + VN * V * C)
                  + 2 * N * tail_mm + 20 * VN * C),
        transcendentals=int(6 * VN * C),
        bytes_accessed=int(4 * (VN * D0 + VN * VN + wcat.size + wtail.size
                                + 2 * V * N * C + N * C)),
    )

    evid_stack, evidence_a = pl.pallas_call(
        kernel,
        out_shape=(
            jax.ShapeDtypeStruct((V, N, C), jnp.float32),
            jax.ShapeDtypeStruct((N, C), jnp.float32),
        ),
        in_specs=[VMEM_SPEC] * 5,
        out_specs=(VMEM_SPEC, VMEM_SPEC),
        cost_estimate=cost,
    )(X_blk, A_blk, wcat, wtail, ce)

    # return the stacked (V, N, C) evidences; consumers index lazily (avoids
    # V extra post-call slice HLOs on a launch-overhead-bound kernel).
    return evid_stack, evidence_a


# ---------------------------------- main ------------------------------------


if __name__ == "__main__":
    key = jax.random.PRNGKey(0)
    num_views = 3
    num_classes = 4
    N = 8
    dims = [[32, 16], [24], [16, 16, 8]]

    kp, kx, ka, kd = jax.random.split(key, 4)
    params = init_params(kp, num_views, dims, num_classes)
    wcat, wtail, meta = pack_params(params, dims, num_classes)

    xkeys = jax.random.split(kx, num_views)
    akeys = jax.random.split(ka, num_views)
    X_list = [jax.random.normal(xkeys[v], (N, dims[v][0]), jnp.float32)
              for v in range(num_views)]
    A_list = []
    for v in range(num_views):
        a = jax.random.uniform(akeys[v], (N, N), jnp.float32)
        A_list.append((a + a.T) * 0.5)   # symmetric non-negative adjacency

    fwd = jax.jit(functools.partial(tuned_forward, meta=meta))
    evid_stack, evidence_a = fwd(wcat, wtail, params["alpha"], X_list, A_list, kd)

    jax.block_until_ready(evid_stack)
    jax.block_until_ready(evidence_a)
    print("KERNEL_OK")
</pallas_src>

<mosaic_0001>
module attributes {stable_mosaic.version = 11 : i64} {
  func.func @_tuned_fused_kernel(%arg0: memref<24x72xf32, #tpu.memory_space<vmem>>, %arg1: memref<24x24xf32, #tpu.memory_space<vmem>>, %arg2: memref<73x120xf32, #tpu.memory_space<vmem>>, %arg3: memref<17x16xf32, #tpu.memory_space<vmem>>, %arg4: memref<3x8x4xf32, #tpu.memory_space<vmem>>, %arg5: memref<3x8x4xf32, #tpu.memory_space<vmem>>, %arg6: memref<8x4xf32, #tpu.memory_space<vmem>>) attributes {dimension_semantics = [], scalar_prefetch = 0 : i64, scratch_operands = 0 : i64, tpu.core_type = #tpu.core_type<tc>} {
    %c0 = arith.constant 0 : index
    %c0_0 = arith.constant 0 : index
    %0 = vector.load %arg0[%c0, %c0_0] : memref<24x72xf32, #tpu.memory_space<vmem>>, vector<24x72xf32>
    %c0_1 = arith.constant 0 : index
    %c0_2 = arith.constant 0 : index
    %1 = vector.load %arg1[%c0_1, %c0_2] : memref<24x24xf32, #tpu.memory_space<vmem>>, vector<24x24xf32>
    %c0_3 = arith.constant 0 : index
    %c0_4 = arith.constant 0 : index
    %2 = vector.load %arg2[%c0_3, %c0_4] : memref<73x120xf32, #tpu.memory_space<vmem>>, vector<73x120xf32>
    %3 = vector.extract_strided_slice %2 {offsets = [0, 0], sizes = [72, 120], strides = [1, 1]} : vector<73x120xf32> to vector<72x120xf32>
    %4 = vector.extract_strided_slice %2 {offsets = [72, 0], sizes = [1, 120], strides = [1, 1]} : vector<73x120xf32> to vector<1x120xf32>
    %5 = vector.extract_strided_slice %3 {offsets = [0, 0], sizes = [72, 36], strides = [1, 1]} : vector<72x120xf32> to vector<72x36xf32>
    %cst = arith.constant dense<0.000000e+00> : vector<24x36xf32>
    %6 = tpu.matmul %0, %5, %cst {dimension_numbers = #tpu.dot_dimension_numbers<[1], [0], [0], [1], [0, 0, 1, 1], [], []>} : vector<24x72xf32>, vector<72x36xf32>, vector<24x36xf32> -> vector<24x36xf32>
    %7 = vector.extract_strided_slice %4 {offsets = [0, 0], sizes = [1, 36], strides = [1, 1]} : vector<1x120xf32> to vector<1x36xf32>
    %8 = vector.broadcast %7 : vector<1x36xf32> to vector<24x36xf32>
    %9 = arith.addf %6, %8 : vector<24x36xf32>
    %10 = vector.extract_strided_slice %3 {offsets = [0, 36], sizes = [72, 72], strides = [1, 1]} : vector<72x120xf32> to vector<72x72xf32>
    %11 = vector.extract_strided_slice %4 {offsets = [0, 36], sizes = [1, 72], strides = [1, 1]} : vector<1x120xf32> to vector<1x72xf32>
    %12 = vector.extract_strided_slice %3 {offsets = [0, 108], sizes = [72, 12], strides = [1, 1]} : vector<72x120xf32> to vector<72x12xf32>
    %13 = vector.extract_strided_slice %4 {offsets = [0, 108], sizes = [1, 12], strides = [1, 1]} : vector<1x120xf32> to vector<1x12xf32>
    %cst_5 = arith.constant dense<0.000000e+00> : vector<24xf32>
    %14 = vector.multi_reduction <add>, %1, %cst_5 [1] : vector<24x24xf32> to vector<24xf32>
    %15 = vector.shape_cast %14 : vector<24xf32> to vector<24x1xf32>
    %cst_6 = arith.constant 1.000000e+00 : f32
    %16 = vector.broadcast %cst_6 : f32 to vector<24x1xf32>
    %17 = arith.addf %15, %16 : vector<24x1xf32>
    %18 = math.rsqrt %17 : vector<24x1xf32>
    %19 = vector.broadcast %18 : vector<24x1xf32> to vector<24x72xf32>
    %20 = arith.mulf %19, %0 : vector<24x72xf32>
    %cst_7 = arith.constant dense<0.000000e+00> : vector<24x72xf32>
    %21 = tpu.matmul %1, %20, %cst_7 {dimension_numbers = #tpu.dot_dimension_numbers<[1], [0], [0], [1], [0, 0, 1, 1], [], []>} : vector<24x24xf32>, vector<24x72xf32>, vector<24x72xf32> -> vector<24x72xf32>
    %22 = arith.addf %21, %20 : vector<24x72xf32>
    %23 = vector.broadcast %18 : vector<24x1xf32> to vector<24x72xf32>
    %24 = arith.mulf %23, %22 : vector<24x72xf32>
    %cst_8 = arith.constant dense<0.000000e+00> : vector<24x72xf32>
    %25 = tpu.matmul %24, %10, %cst_8 {dimension_numbers = #tpu.dot_dimension_numbers<[1], [0], [0], [1], [0, 0, 1, 1], [], []>} : vector<24x72xf32>, vector<72x72xf32>, vector<24x72xf32> -> vector<24x72xf32>
    %26 = vector.broadcast %11 : vector<1x72xf32> to vector<24x72xf32>
    %27 = arith.addf %25, %26 : vector<24x72xf32>
    %cst_9 = arith.constant dense<0.000000e+00> : vector<24x12xf32>
    %28 = tpu.matmul %27, %12, %cst_9 {dimension_numbers = #tpu.dot_dimension_numbers<[1], [0], [0], [1], [0, 0, 1, 1], [], []>} : vector<24x72xf32>, vector<72x12xf32>, vector<24x12xf32> -> vector<24x12xf32>
    %29 = vector.broadcast %18 : vector<24x1xf32> to vector<24x12xf32>
    %30 = arith.mulf %29, %28 : vector<24x12xf32>
    %cst_10 = arith.constant dense<0.000000e+00> : vector<24x12xf32>
    %31 = tpu.matmul %1, %30, %cst_10 {dimension_numbers = #tpu.dot_dimension_numbers<[1], [0], [0], [1], [0, 0, 1, 1], [], []>} : vector<24x24xf32>, vector<24x12xf32>, vector<24x12xf32> -> vector<24x12xf32>
    %32 = arith.addf %31, %30 : vector<24x12xf32>
    %33 = vector.broadcast %18 : vector<24x1xf32> to vector<24x12xf32>
    %34 = arith.mulf %33, %32 : vector<24x12xf32>
    %35 = vector.broadcast %13 : vector<1x12xf32> to vector<24x12xf32>
    %36 = arith.addf %34, %35 : vector<24x12xf32>
    %cst_11 = arith.constant 0.000000e+00 : f32
    %37 = vector.broadcast %cst_11 : f32 to vector<24x12xf32>
    %38 = arith.maximumf %36, %37 : vector<24x12xf32>
    %39 = math.absf %36 : vector<24x12xf32>
    %cst_12 = arith.constant 0.000000e+00 : f32
    %40 = vector.broadcast %cst_12 : f32 to vector<24x12xf32>
    %41 = arith.subf %40, %39 : vector<24x12xf32>
    %42 = math.exp %41 : vector<24x12xf32>
    %cst_13 = arith.constant 1.000000e+00 : f32
    %43 = vector.broadcast %cst_13 : f32 to vector<24x12xf32>
    %44 = arith.addf %43, %42 : vector<24x12xf32>
    %45 = math.log %44 : vector<24x12xf32>
    %46 = arith.addf %38, %45 : vector<24x12xf32>
    %c0_14 = arith.constant 0 : index
    %c0_15 = arith.constant 0 : index
    %47 = vector.load %arg3[%c0_14, %c0_15] : memref<17x16xf32, #tpu.memory_space<vmem>>, vector<17x16xf32>
    %c0_16 = arith.constant 0 : index
    %c0_17 = arith.constant 0 : index
    %c0_18 = arith.constant 0 : index
    %48 = vector.load %arg4[%c0_16, %c0_17, %c0_18] : memref<3x8x4xf32, #tpu.memory_space<vmem>>, vector<3x8x4xf32>
    %49 = vector.extract_strided_slice %9 {offsets = [0, 0], sizes = [8, 16], strides = [1, 1]} : vector<24x36xf32> to vector<8x16xf32>
    %cst_19 = arith.constant 0.000000e+00 : f32
    %50 = vector.broadcast %cst_19 : f32 to vector<8x16xf32>
    %51 = arith.maximumf %49, %50 : vector<8x16xf32>
    %52 = vector.extract_strided_slice %47 {offsets = [0, 0], sizes = [16, 4], strides = [1, 1]} : vector<17x16xf32> to vector<16x4xf32>
    %53 = vector.extract_strided_slice %47 {offsets = [16, 0], sizes = [1, 4], strides = [1, 1]} : vector<17x16xf32> to vector<1x4xf32>
    %cst_20 = arith.constant dense<0.000000e+00> : vector<8x4xf32>
    %54 = tpu.matmul %51, %52, %cst_20 {dimension_numbers = #tpu.dot_dimension_numbers<[1], [0], [0], [1], [0, 0, 1, 1], [], []>} : vector<8x16xf32>, vector<16x4xf32>, vector<8x4xf32> -> vector<8x4xf32>
    %55 = vector.broadcast %53 : vector<1x4xf32> to vector<8x4xf32>
    %56 = arith.addf %54, %55 : vector<8x4xf32>
    %cst_21 = arith.constant 0.000000e+00 : f32
    %57 = vector.broadcast %cst_21 : f32 to vector<8x4xf32>
    %58 = arith.maximumf %56, %57 : vector<8x4xf32>
    %59 = math.absf %56 : vector<8x4xf32>
    %cst_22 = arith.constant 0.000000e+00 : f32
    %60 = vector.broadcast %cst_22 : f32 to vector<8x4xf32>
    %61 = arith.subf %60, %59 : vector<8x4xf32>
    %62 = math.exp %61 : vector<8x4xf32>
    %cst_23 = arith.constant 1.000000e+00 : f32
    %63 = vector.broadcast %cst_23 : f32 to vector<8x4xf32>
    %64 = arith.addf %63, %62 : vector<8x4xf32>
    %65 = math.log %64 : vector<8x4xf32>
    %66 = arith.addf %58, %65 : vector<8x4xf32>
    %67 = vector.extract_strided_slice %46 {offsets = [0, 0], sizes = [8, 4], strides = [1, 1]} : vector<24x12xf32> to vector<8x4xf32>
    %68 = arith.addf %66, %67 : vector<8x4xf32>
    %69 = vector.extract_strided_slice %48 {offsets = [0, 0, 0], sizes = [1, 8, 4], strides = [1, 1, 1]} : vector<3x8x4xf32> to vector<1x8x4xf32>
    %70 = vector.shape_cast %69 : vector<1x8x4xf32> to vector<8x4xf32>
    %cst_24 = arith.constant 1.000000e-01 : f32
    %71 = vector.broadcast %cst_24 : f32 to vector<8x4xf32>
    %72 = arith.mulf %71, %70 : vector<8x4xf32>
    %73 = arith.addf %68, %72 : vector<8x4xf32>
    %74 = vector.extract_strided_slice %9 {offsets = [8, 16], sizes = [8, 4], strides = [1, 1]} : vector<24x36xf32> to vector<8x4xf32>
    %cst_25 = arith.constant 0.000000e+00 : f32
    %75 = vector.broadcast %cst_25 : f32 to vector<8x4xf32>
    %76 = arith.maximumf %74, %75 : vector<8x4xf32>
    %77 = math.absf %74 : vector<8x4xf32>
    %cst_26 = arith.constant 0.000000e+00 : f32
    %78 = vector.broadcast %cst_26 : f32 to vector<8x4xf32>
    %79 = arith.subf %78, %77 : vector<8x4xf32>
    %80 = math.exp %79 : vector<8x4xf32>
    %cst_27 = arith.constant 1.000000e+00 : f32
    %81 = vector.broadcast %cst_27 : f32 to vector<8x4xf32>
    %82 = arith.addf %81, %80 : vector<8x4xf32>
    %83 = math.log %82 : vector<8x4xf32>
    %84 = arith.addf %76, %83 : vector<8x4xf32>
    %85 = vector.extract_strided_slice %46 {offsets = [8, 4], sizes = [8, 4], strides = [1, 1]} : vector<24x12xf32> to vector<8x4xf32>
    %86 = arith.addf %84, %85 : vector<8x4xf32>
    %87 = vector.extract_strided_slice %48 {offsets = [1, 0, 0], sizes = [1, 8, 4], strides = [1, 1, 1]} : vector<3x8x4xf32> to vector<1x8x4xf32>
    %88 = vector.shape_cast %87 : vector<1x8x4xf32> to vector<8x4xf32>
    %cst_28 = arith.constant 1.000000e-01 : f32
    %89 = vector.broadcast %cst_28 : f32 to vector<8x4xf32>
    %90 = arith.mulf %89, %88 : vector<8x4xf32>
    %91 = arith.addf %86, %90 : vector<8x4xf32>
    %92 = vector.extract_strided_slice %9 {offsets = [16, 20], sizes = [8, 16], strides = [1, 1]} : vector<24x36xf32> to vector<8x16xf32>
    %cst_29 = arith.constant 0.000000e+00 : f32
    %93 = vector.broadcast %cst_29 : f32 to vector<8x16xf32>
    %94 = arith.maximumf %92, %93 : vector<8x16xf32>
    %95 = vector.extract_strided_slice %47 {offsets = [0, 4], sizes = [16, 8], strides = [1, 1]} : vector<17x16xf32> to vector<16x8xf32>
    %96 = vector.extract_strided_slice %47 {offsets = [16, 4], sizes = [1, 8], strides = [1, 1]} : vector<17x16xf32> to vector<1x8xf32>
    %cst_30 = arith.constant dense<0.000000e+00> : vector<8x8xf32>
    %97 = tpu.matmul %94, %95, %cst_30 {dimension_numbers = #tpu.dot_dimension_numbers<[1], [0], [0], [1], [0, 0, 1, 1], [], []>} : vector<8x16xf32>, vector<16x8xf32>, vector<8x8xf32> -> vector<8x8xf32>
    %98 = vector.broadcast %96 : vector<1x8xf32> to vector<8x8xf32>
    %99 = arith.addf %97, %98 : vector<8x8xf32>
    %cst_31 = arith.constant 0.000000e+00 : f32
    %100 = vector.broadcast %cst_31 : f32 to vector<8x8xf32>
    %101 = arith.maximumf %99, %100 : vector<8x8xf32>
    %102 = vector.extract_strided_slice %47 {offsets = [0, 12], sizes = [8, 4], strides = [1, 1]} : vector<17x16xf32> to vector<8x4xf32>
    %103 = vector.extract_strided_slice %47 {offsets = [16, 12], sizes = [1, 4], strides = [1, 1]} : vector<17x16xf32> to vector<1x4xf32>
    %cst_32 = arith.constant dense<0.000000e+00> : vector<8x4xf32>
    %104 = tpu.matmul %101, %102, %cst_32 {dimension_numbers = #tpu.dot_dimension_numbers<[1], [0], [0], [1], [0, 0, 1, 1], [], []>} : vector<8x8xf32>, vector<8x4xf32>, vector<8x4xf32> -> vector<8x4xf32>
    %105 = vector.broadcast %103 : vector<1x4xf32> to vector<8x4xf32>
    %106 = arith.addf %104, %105 : vector<8x4xf32>
    %cst_33 = arith.constant 0.000000e+00 : f32
    %107 = vector.broadcast %cst_33 : f32 to vector<8x4xf32>
    %108 = arith.maximumf %106, %107 : vector<8x4xf32>
    %109 = math.absf %106 : vector<8x4xf32>
    %cst_34 = arith.constant 0.000000e+00 : f32
    %110 = vector.broadcast %cst_34 : f32 to vector<8x4xf32>
    %111 = arith.subf %110, %109 : vector<8x4xf32>
    %112 = math.exp %111 : vector<8x4xf32>
    %cst_35 = arith.constant 1.000000e+00 : f32
    %113 = vector.broadcast %cst_35 : f32 to vector<8x4xf32>
    %114 = arith.addf %113, %112 : vector<8x4xf32>
    %115 = math.log %114 : vector<8x4xf32>
    %116 = arith.addf %108, %115 : vector<8x4xf32>
    %117 = vector.extract_strided_slice %46 {offsets = [16, 8], sizes = [8, 4], strides = [1, 1]} : vector<24x12xf32> to vector<8x4xf32>
    %118 = arith.addf %116, %117 : vector<8x4xf32>
    %119 = vector.extract_strided_slice %48 {offsets = [2, 0, 0], sizes = [1, 8, 4], strides = [1, 1, 1]} : vector<3x8x4xf32> to vector<1x8x4xf32>
    %120 = vector.shape_cast %119 : vector<1x8x4xf32> to vector<8x4xf32>
    %cst_36 = arith.constant 1.000000e-01 : f32
    %121 = vector.broadcast %cst_36 : f32 to vector<8x4xf32>
    %122 = arith.mulf %121, %120 : vector<8x4xf32>
    %123 = arith.addf %118, %122 : vector<8x4xf32>
    %124 = vector.shape_cast %73 : vector<8x4xf32> to vector<1x8x4xf32>
    %125 = vector.shape_cast %91 : vector<8x4xf32> to vector<1x8x4xf32>
    %126 = vector.shape_cast %123 : vector<8x4xf32> to vector<1x8x4xf32>
    %127 = tpu.concatenate %124, %125, %126 in 0 : vector<1x8x4xf32>, vector<1x8x4xf32>, vector<1x8x4xf32> -> vector<3x8x4xf32>
    %c0_37 = arith.constant 0 : index
    %c0_38 = arith.constant 0 : index
    %c0_39 = arith.constant 0 : index
    %128 = vector.load %arg5[%c0_37, %c0_38, %c0_39] : memref<3x8x4xf32, #tpu.memory_space<vmem>>, vector<3x8x4xf32>
    tpu.vector_store %arg5[%c0_37, %c0_38, %c0_39], %127 {strides = array<i32>} : memref<3x8x4xf32, #tpu.memory_space<vmem>>, vector<3x8x4xf32>,
    %129 = arith.mulf %73, %73 : vector<8x4xf32>
    %cst_40 = arith.constant dense<0.000000e+00> : vector<8xf32>
    %130 = vector.multi_reduction <add>, %129, %cst_40 [1] : vector<8x4xf32> to vector<8xf32>
    %131 = vector.shape_cast %130 : vector<8xf32> to vector<8x1xf32>
    %cst_41 = arith.constant 1.000000e-16 : f32
    %132 = vector.broadcast %cst_41 : f32 to vector<8x1xf32>
    %133 = arith.maximumf %131, %132 : vector<8x1xf32>
    %134 = math.rsqrt %133 : vector<8x1xf32>
    %135 = vector.broadcast %134 : vector<8x1xf32> to vector<8x4xf32>
    %136 = arith.mulf %73, %135 : vector<8x4xf32>
    %137 = arith.mulf %91, %91 : vector<8x4xf32>
    %cst_42 = arith.constant dense<0.000000e+00> : vector<8xf32>
    %138 = vector.multi_reduction <add>, %137, %cst_42 [1] : vector<8x4xf32> to vector<8xf32>
    %139 = vector.shape_cast %138 : vector<8xf32> to vector<8x1xf32>
    %cst_43 = arith.constant 1.000000e-16 : f32
    %140 = vector.broadcast %cst_43 : f32 to vector<8x1xf32>
    %141 = arith.maximumf %139, %140 : vector<8x1xf32>
    %142 = math.rsqrt %141 : vector<8x1xf32>
    %143 = vector.broadcast %142 : vector<8x1xf32> to vector<8x4xf32>
    %144 = arith.mulf %91, %143 : vector<8x4xf32>
    %145 = arith.mulf %123, %123 : vector<8x4xf32>
    %cst_44 = arith.constant dense<0.000000e+00> : vector<8xf32>
    %146 = vector.multi_reduction <add>, %145, %cst_44 [1] : vector<8x4xf32> to vector<8xf32>
    %147 = vector.shape_cast %146 : vector<8xf32> to vector<8x1xf32>
    %cst_45 = arith.constant 1.000000e-16 : f32
    %148 = vector.broadcast %cst_45 : f32 to vector<8x1xf32>
    %149 = arith.maximumf %147, %148 : vector<8x1xf32>
    %150 = math.rsqrt %149 : vector<8x1xf32>
    %151 = vector.broadcast %150 : vector<8x1xf32> to vector<8x4xf32>
    %152 = arith.mulf %123, %151 : vector<8x4xf32>
    %153 = arith.mulf %136, %144 : vector<8x4xf32>
    %cst_46 = arith.constant dense<0.000000e+00> : vector<8xf32>
    %154 = vector.multi_reduction <add>, %153, %cst_46 [1] : vector<8x4xf32> to vector<8xf32>
    %155 = vector.shape_cast %154 : vector<8xf32> to vector<8x1xf32>
    %cst_47 = arith.constant dense<0.000000e+00> : vector<1xf32>
    %156 = vector.multi_reduction <add>, %155, %cst_47 [0] : vector<8x1xf32> to vector<1xf32>
    %157 = vector.shape_cast %156 : vector<1xf32> to vector<1x1xf32>
    %cst_48 = arith.constant 1.250000e-01 : f32
    %158 = vector.broadcast %cst_48 : f32 to vector<1x1xf32>
    %159 = arith.mulf %157, %158 : vector<1x1xf32>
    %160 = arith.mulf %136, %152 : vector<8x4xf32>
    %cst_49 = arith.constant dense<0.000000e+00> : vector<8xf32>
    %161 = vector.multi_reduction <add>, %160, %cst_49 [1] : vector<8x4xf32> to vector<8xf32>
    %162 = vector.shape_cast %161 : vector<8xf32> to vector<8x1xf32>
    %cst_50 = arith.constant dense<0.000000e+00> : vector<1xf32>
    %163 = vector.multi_reduction <add>, %162, %cst_50 [0] : vector<8x1xf32> to vector<1xf32>
    %164 = vector.shape_cast %163 : vector<1xf32> to vector<1x1xf32>
    %cst_51 = arith.constant 1.250000e-01 : f32
    %165 = vector.broadcast %cst_51 : f32 to vector<1x1xf32>
    %166 = arith.mulf %164, %165 : vector<1x1xf32>
    %167 = arith.mulf %144, %152 : vector<8x4xf32>
    %cst_52 = arith.constant dense<0.000000e+00> : vector<8xf32>
    %168 = vector.multi_reduction <add>, %167, %cst_52 [1] : vector<8x4xf32> to vector<8xf32>
    %169 = vector.shape_cast %168 : vector<8xf32> to vector<8x1xf32>
    %cst_53 = arith.constant dense<0.000000e+00> : vector<1xf32>
    %170 = vector.multi_reduction <add>, %169, %cst_53 [0] : vector<8x1xf32> to vector<1xf32>
    %171 = vector.shape_cast %170 : vector<1xf32> to vector<1x1xf32>
    %cst_54 = arith.constant 1.250000e-01 : f32
    %172 = vector.broadcast %cst_54 : f32 to vector<1x1xf32>
    %173 = arith.mulf %171, %172 : vector<1x1xf32>
    %174 = arith.maximumf %159, %166 : vector<1x1xf32>
    %175 = arith.maximumf %174, %173 : vector<1x1xf32>
    %cst_55 = arith.constant 0.699999988 : f32
    %176 = vector.broadcast %cst_55 : f32 to vector<1x1xf32>
    %177 = arith.mulf %176, %175 : vector<1x1xf32>
    %178 = arith.cmpf ogt, %159, %177 : vector<1x1xf32>
    %cst_56 = arith.constant 0.000000e+00 : f32
    %179 = vector.broadcast %cst_56 : f32 to vector<1x1xf32>
    %180 = arith.select %178, %159, %179 : vector<1x1xi1>, vector<1x1xf32>
    %181 = arith.cmpf ogt, %166, %177 : vector<1x1xf32>
    %cst_57 = arith.constant 0.000000e+00 : f32
    %182 = vector.broadcast %cst_57 : f32 to vector<1x1xf32>
    %183 = arith.select %181, %166, %182 : vector<1x1xi1>, vector<1x1xf32>
    %184 = math.exp %180 : vector<1x1xf32>
    %185 = math.exp %183 : vector<1x1xf32>
    %186 = arith.addf %184, %185 : vector<1x1xf32>
    %187 = tpu.reciprocal %186 {approx = true} : vector<1x1xf32> -> vector<1x1xf32>
    %188 = arith.mulf %184, %187 : vector<1x1xf32>
    %189 = arith.mulf %185, %187 : vector<1x1xf32>
    %cst_58 = arith.constant 1.000000e+00 : f32
    %190 = vector.broadcast %cst_58 : f32 to vector<1x1xf32>
    %191 = arith.addf %188, %190 : vector<1x1xf32>
    %cst_59 = arith.constant 1.000000e+00 : f32
    %192 = vector.broadcast %cst_59 : f32 to vector<1x1xf32>
    %193 = arith.addf %189, %192 : vector<1x1xf32>
    %cst_60 = arith.constant 0.166666672 : f32
    %194 = vector.broadcast %cst_60 : f32 to vector<8x4xf32>
    %195 = arith.mulf %194, %73 : vector<8x4xf32>
    %cst_61 = arith.constant 0.166666672 : f32
    %196 = vector.broadcast %cst_61 : f32 to vector<1x1xf32>
    %197 = arith.mulf %191, %196 : vector<1x1xf32>
    %198 = vector.broadcast %197 : vector<1x1xf32> to vector<8x4xf32>
    %199 = arith.mulf %198, %91 : vector<8x4xf32>
    %200 = arith.addf %195, %199 : vector<8x4xf32>
    %cst_62 = arith.constant 0.166666672 : f32
    %201 = vector.broadcast %cst_62 : f32 to vector<1x1xf32>
    %202 = arith.mulf %193, %201 : vector<1x1xf32>
    %203 = vector.broadcast %202 : vector<1x1xf32> to vector<8x4xf32>
    %204 = arith.mulf %203, %123 : vector<8x4xf32>
    %205 = arith.addf %200, %204 : vector<8x4xf32>
    %c0_63 = arith.constant 0 : index
    %c0_64 = arith.constant 0 : index
    %206 = vector.load %arg6[%c0_63, %c0_64] : memref<8x4xf32, #tpu.memory_space<vmem>>, vector<8x4xf32>
    tpu.vector_store %arg6[%c0_63, %c0_64], %205 {strides = array<i32>} : memref<8x4xf32, #tpu.memory_space<vmem>>, vector<8x4xf32>,
    return
  }
}

</mosaic_0001>

<bundles_post_ra>
// kernel: tuned_forward.1
= control target key start
LH: loop header
LB: loop body
LE: loop exit
PB: predicated region body
PF: predicated region fallthrough
CT: control target
= control target key end

     0   :  { %vm132_vm0 = vcmask 195584   ;;  %v1377_v6 = vmov 0.0|0.0   ;;  %vm1378_vm1 = vmmov 0   ;;  %v1379_v7 = vmov 0.0   ;;  %s1380_s14 = smov 92   ;;  %s1382_s7 = smov 124   ;;  %s1752_s1 = inlined_call_operand.vmem [shape: f32[24,24], index: 1, kind: input, shape index: {}]   ;;  %s1753_s2 = inlined_call_operand.vmem [shape: f32[73,120], index: 2, kind: input, shape index: {}]   ;;  %s1754_s0 = inlined_call_operand.vmem [shape: f32[24,72], index: 0, kind: input, shape index: {}]   ;;  %s1755_s3 = inlined_call_operand.vmem [shape: f32[17,16], index: 3, kind: input, shape index: {}]   ;;  %s1756_s4 = inlined_call_operand.vmem [shape: f32[3,8,4], index: 4, kind: input, shape index: {}]   ;;  %s1757_s5 = inlined_call_operand.vmem [shape: f32[3,8,4], index: 5, kind: output, shape index: {0}]   ;;  %s1758_s6 = inlined_call_operand.vmem [shape: f32[8,4], index: 6, kind: output, shape index: {1}]  }
   0x1   :  { %v1427_v0 = vld [vmem:[%s1752_s1] sm:$0xff]  ;;  %v1432_v1 = vld [vmem:[%s1752_s1 + $0x8] sm:$0xff]  ;;  %v1437_v2 = vld [vmem:[%s1752_s1 + $0x10] sm:$0xff]  ;;  %1242 = vmatprep.subr.bf16.mxu1 %v1377_v6  ;;  %1230 = vmatprep.subr.bf16.mxu0 %v1377_v6  ;;  %vm42_vm2 = vcmask 588800   ;;  %s1383_s8 = smov 108   ;;  %vm618_vm3 = vcmask 130048  }
   0x2   :  { %v133_v3 = vsel %vm132_vm0, %v1427_v0, 0.0  ;;  %v139_v4 = vsel %vm132_vm0, %v1437_v2, 0.0  ;;  %v136_v5 = vsel %vm132_vm0, %v1432_v1, 0.0  ;;  %1133 = vmatprep.mubr.msk.f32.mxu1 %vm1378_vm1, %v1379_v7  ;;  %1118 = vmatprep.mubr.msk.f32.mxu0 %vm1378_vm1, %v1379_v7  ;;  %v1454_v8 = vld [vmem:[%s1753_s2] sm:$0xff]  ;;  %v1459_v9 = vld [vmem:[%s1753_s2 + $0x8] sm:$0xff]  ;;  %v1464_v10 = vld [vmem:[%s1753_s2 + $0x10] sm:$0xff] }
   0x3   :  { %134 = vadd.xlane.f32.xlu0 %v133_v3  ;;  %140 = vadd.xlane.f32.xlu1 %v139_v4  ;;  %v1468_v11 = vpack.i.bf16 %v1459_v9, %v1454_v8  ;;  %v1473_v12 = vld [vmem:[%s1753_s2 + $0x18] sm:$0xff]  ;;  %v1478_v13 = vld [vmem:[%s1753_s2 + $0x20] sm:$0xff]  ;;  %v1483_v14 = vld [vmem:[%s1753_s2 + $0x28] sm:$0xff]  ;;  %v1231_v54 = vpack.c.bf16 %v1459_v9, %v1454_v8  ;;  %s1384_s11 = smov 116   ;;  %s1385_s13 = smov 16   ;;  %vm819_vm4 = vcmask 64512  }
   0x4   :  { %v1487_v15 = vpack.i.bf16 %v1473_v12, %v1464_v10  ;;  %v1493_v16 = vpack.i.bf16 %v1483_v14, %v1478_v13  ;;  %v1500_v17 = vld [vmem:[%s1753_s2 + $0x30] sm:$0xff]  ;;  %v1505_v18 = vld [vmem:[%s1753_s2 + $0x38] sm:$0xff]  ;;  %v1518_v20 = vld [vmem:[%s1753_s2 + $0x40] sm:$0xff]  ;;  %v1234_v55 = vpack.c.bf16 %v1473_v12, %v1464_v10  ;;  %v1237_v56 = vpack.c.bf16 %v1483_v14, %v1478_v13  ;;  %s1386_s16 = smov 12   ;;  %s1387_s19 = smov 120  }
   0x5   :  { %v1511_v19 = vpack.i.bf16 %v1505_v18, %v1500_v17  ;;  %v1527_v28 = vld [vmem:[%s1754_s0] sm:$0xff]  ;;  %v1532_v29 = vld [vmem:[%s1754_s0 + $0x8] sm:$0xff]  ;;  %v1549_v34 = vld [vmem:[%s1754_s0 + $0x10] sm:$0xff]  ;;  %1232 = vmatpush3.bf16.msra.mxu0 %v1231_v54  ;;  %s1381_s0 = smov 20   ;;  %v1240_v58 = vpack.c.bf16 %v1505_v18, %v1500_v17  ;;  %vm913_vm5 = vcmask 31744   ;;  %s1388_s20 = smov 112  }
   0x6   :  { %1233 = vmatprep.subr.bf16.mxu0 %v1377_v6  ;;  %v1596_v57 = vld [vmem:[%s1753_s2 + $0x48] ss:$0 sm:$0xff] }
   0x7   :  { %137 = vadd.xlane.f32.xlu0 %v136_v5 }
   0x9   :  { %1235 = vmatpush3.bf16.msra.mxu0 %v1234_v55 }
   0xa   :  { %1236 = vmatprep.subr.bf16.mxu0 %v1377_v6 }
   0xd   :  { %1238 = vmatpush3.bf16.msra.mxu0 %v1237_v56  ;;  %v1040_v56 = vld [vmem:[%s1755_s3 + $0x10] ss:$0 sm:$0xff] }
   0xe   :  { %1239 = vmatprep.subr.bf16.mxu0 %v1377_v6 }
  0x11   :  { %1241 = vmatpush3.bf16.msra.mxu0 %v1240_v58 }
  0x12   :  { %1116 = vmatprep.subr.mxu0 %v1379_v7 }
  0x14   :  { %1291 = vrot.lane.b32.xlu1 %v1468_v11, %s1380_s14 }
  0x15   :  { %1117 = vmatpush3.msra.mxu0 %v1518_v20 }
  0x16   :  { %1119 = vmatmul.mubr.msk.f32.vlgmr.msra.gmra.mrb[0].mxu0 %vm42_vm2, %v1527_v28  ;;  %1257 = vmatprep.subr.bf16.mxu0 %v1377_v6 }
  0x17   :  { %1121 = vmatprep.mubr.msk.f32.mxu0 %vm1378_vm1, %v1379_v7 }
  0x18   :  { %1301 = vrot.lane.b32.xlu1 %v1493_v16, %s1380_s14 }
  0x1a   :  { %1122 = vmatmul.mubr.msk.f32.gmra.mrb[2].mxu0 %vm42_vm2, %v1532_v29 }
  0x1b   :  { %1124 = vmatprep.mubr.msk.f32.mxu0 %vm1378_vm1, %v1379_v7 }
  0x1c   :  { %1306 = vrot.lane.b32.xlu1 %v1511_v19, %s1380_s14 }
  0x1d   :  { %1296 = vrot.lane.b32.xlu0 %v1487_v15, %s1380_s14 }
  0x1e   :  { %1125 = vmatmul.mubr.msk.f32.gmra.mrb[4].mxu0 %vm42_vm2, %v1549_v34 }
  0x1f   :  { %1187 = vmatprep.mubr.msk.f32.mxu0 %vm1378_vm1, %v1379_v7 }
  0x20   :  { %268 = vrot.lane.b32.xlu1 %v1518_v20, %s1380_s14 }
  0x21   :  { %1311 = vrot.lane.b32.xlu0 %v1468_v11, %s1381_s0 }
  0x24   :  { %1316 = vrot.lane.b32.xlu1 %v1487_v15, %s1381_s0 }
  0x25   :  { %1321 = vrot.lane.b32.xlu0 %v1493_v16, %s1381_s0 }
  0x28   :  { %1326 = vrot.lane.b32.xlu1 %v1511_v19, %s1381_s0 }
  0x29   :  { %280 = vrot.lane.b32.xlu0 %v1596_v57, %s1380_s14 }
  0x2c   :  { %388 = vrot.lane.b32.xlu1 %v1518_v20, %s1381_s0 }
  0x90   :  { %v135_v21 = vpop.xlane.xlu0 %134  ;;  %v141_v23 = vpop.xlane.xlu1 %140 }
  0x91   :  { %v142_v22 = vadd.f32 1.0, %v135_v21  ;;  %v144_v26 = vadd.f32 1.0, %v141_v23 }
  0x93   :  { %1335 = vrsqrt.f32 %v142_v22 }
  0x94   :  { %v138_v24 = vpop.xlane.xlu0 %137  ;;  %v1292_v37 = vpop.permute.xlu1 %1291 }
  0x95   :  { %v143_v25 = vadd.f32 1.0, %v138_v24  ;;  %v1294_v38 = vunpack.i.h.bf16 %v1292_v37  ;;  %v1293_v39 = vunpack.i.l.bf16 %v1292_v37 }
  0x97   :  { %1337 = vrsqrt.f32 %v143_v25  ;;  %v1246_v43 = vpack.c.bf16 %v1294_v38, %v1293_v39 }
  0x98   :  { %1339 = vrsqrt.f32 %v144_v26  ;;  %v1297_v40 = vpop.permute.xlu0 %1296  ;;  %v1302_v44 = vpop.permute.xlu1 %1301 }
  0x99   :  { %v1299_v41 = vunpack.i.h.bf16 %v1297_v40  ;;  %v1298_v42 = vunpack.i.l.bf16 %v1297_v40  ;;  %v1304_v46 = vunpack.i.h.bf16 %v1302_v44  ;;  %v1303_v47 = vunpack.i.l.bf16 %v1302_v44 }
  0x9b   :  { %v1249_v45 = vpack.c.bf16 %v1299_v41, %v1298_v42  ;;  %v1252_v49 = vpack.c.bf16 %v1304_v46, %v1303_v47 }
  0x9c   :  { %v1307_v48 = vpop.permute.xlu1 %1306  ;;  %v1312_v62 = vpop.permute.xlu0 %1311 }
  0x9d   :  { %v1522_v27 = vpop.eup %1335  ;;  %v1309_v50 = vunpack.i.h.bf16 %v1307_v48  ;;  %v1308_v51 = vunpack.i.l.bf16 %v1307_v48  ;;  %v1314_v63 = vunpack.i.h.bf16 %v1312_v62  ;;  %v1313_v3 = vunpack.i.l.bf16 %v1312_v62 }
  0x9e   :  { %v1538_v31 = vmul.f32 %v1522_v27, %v1527_v28 }
  0x9f   :  { %v1255_v52 = vpack.c.bf16 %v1309_v50, %v1308_v51  ;;  %v1258_v11 = vpack.c.bf16 %v1314_v63, %v1313_v3 }
  0xa0   :  { %v269_v53 = vpop.permute.xlu1 %268  ;;  %v1322_v14 = vpop.permute.xlu0 %1321 }
  0xa1   :  { %v1534_v30 = vpop.eup %1337  ;;  %1259 = vmatpush3.bf16.msra.mxu0 %v1258_v11  ;;  %v1324_v16 = vunpack.i.h.bf16 %v1322_v14  ;;  %v1323_v17 = vunpack.i.l.bf16 %v1322_v14 }
  0xa2   :  { %v1542_v32 = vmul.f32 %v1534_v30, %v1532_v29  ;;  %v1544_v33 = vpop.eup %1339  ;;  %1260 = vmatprep.subr.bf16.mxu0 %v1377_v6 }
  0xa3   :  { %v1555_v36 = vmul.f32 %v1544_v33, %v1549_v34  ;;  %v1264_v23 = vpack.c.bf16 %v1324_v16, %v1323_v17 }
  0xa4   :  { %v1243_v35 = vpack.c.bf16 %v1542_v32, %v1538_v31  ;;  %v1317_v4 = vpop.permute.xlu1 %1316 }
  0xa5   :  { %v1319_v8 = vunpack.i.h.bf16 %v1317_v4  ;;  %v1318_v9 = vunpack.i.l.bf16 %v1317_v4 }
  0xa6   :  { %1244 = vmatpush3.bf16.msra.mxu1 %v1243_v35 }
  0xa7   :  { %1131 = vmatprep.subr.mxu1 %v1379_v7  ;;  %v1261_v15 = vpack.c.bf16 %v1319_v8, %v1318_v9 }
  0xa8   :  { %v1327_v19 = vpop.permute.xlu1 %1326 }
  0xa9   :  { %1262 = vmatpush3.bf16.msra.mxu0 %v1261_v15  ;;  %v1329_v24 = vunpack.i.h.bf16 %v1327_v19  ;;  %v1328_v25 = vunpack.i.l.bf16 %v1327_v19 }
  0xaa   :  { %1132 = vmatpush3.msra.mxu1 %v1555_v36  ;;  %1263 = vmatprep.subr.bf16.mxu0 %v1377_v6 }
  0xab   :  { %1134 = vmatmul.mubr.msk.f32.vlgmr.msra.gmra.mrb[0].mxu1 %vm132_vm0, %v1427_v0  ;;  %1245 = vmatprep.subr.bf16.mxu1 %v1377_v6  ;;  %v1267_v28 = vpack.c.bf16 %v1329_v24, %v1328_v25 }
  0xac   :  { %1136 = vmatprep.mubr.msk.f32.mxu1 %vm1378_vm1, %v1379_v7  ;;  %1247 = vmatpush3.bf16.msra.mxu1 %v1246_v43  ;;  %v389_v29 = vpop.permute.xlu1 %388  ;;  %v281_v43 = vpop.permute.xlu0 %280 }
  0xad   :  { %1248 = vmatprep.subr.bf16.mxu1 %v1377_v6  ;;  %1265 = vmatpush3.bf16.msra.mxu0 %v1264_v23 }
  0xae   :  { %1266 = vmatprep.subr.bf16.mxu0 %v1377_v6 }
  0xaf   :  { %1137 = vmatmul.mubr.msk.f32.gmra.mrb[2].mxu1 %vm132_vm0, %v1432_v1 }
  0xb0   :  { %1139 = vmatprep.mubr.msk.f32.mxu1 %vm1378_vm1, %v1379_v7  ;;  %1250 = vmatpush3.bf16.msra.mxu1 %v1249_v45 }
  0xb1   :  { %1251 = vmatprep.subr.bf16.mxu1 %v1377_v6  ;;  %1268 = vmatpush3.bf16.msra.mxu0 %v1267_v28 }
  0xb2   :  { %1185 = vmatprep.subr.mxu0 %v1379_v7 }
  0xb3   :  { %1140 = vmatmul.mubr.msk.f32.gmra.mrb[4].mxu1 %vm132_vm0, %v1437_v2 }
  0xb4   :  { %1160 = vmatprep.mubr.msk.f32.mxu1 %vm1378_vm1, %v1379_v7  ;;  %1253 = vmatpush3.bf16.msra.mxu1 %v1252_v49 }
  0xb5   :  { %1254 = vmatprep.subr.bf16.mxu1 %v1377_v6  ;;  %1186 = vmatpush3.msra.mxu0 %v389_v29 }
  0xb6   :  { %1272 = vmatprep.subr.bf16.mxu0 %v1377_v6 }
  0xb8   :  { %1256 = vmatpush3.bf16.msra.mxu1 %v1255_v52 }
  0xb9   :  { %1158 = vmatprep.subr.mxu1 %v1379_v7 }
  0xbc   :  { %1159 = vmatpush3.msra.mxu1 %v269_v53 }
  0xbd   :  { %1269 = vmatprep.subr.bf16.mxu1 %v1377_v6 }
  0xe9   :  { %v118_v35 = vpop.f32.mrb[0].mxu0 }
  0xea   :  { %v119_v51 = vadd.f32 %v1596_v57, %v118_v35 }
  0xec   :  { %v613_v55 = vmax.f32 %v119_v51, 0.0 }
 0x17e   :  { %v226_v59 = vpop.f32.mrb[0].mxu1 }
 0x17f   :  { %v227_v60 = vadd.f32 %v226_v59, %v1538_v31  ;;  %v1135_v61 = vpop.f32.mrb[1].mxu1  ;;  %v607_v31 = vld [vmem:[%s1755_s3] sm:$0xff] }
 0x181   :  { %v240_v5 = vmul.f32 %v1522_v27, %v227_v60 }
 0x182   :  { %v231_v10 = vpop.f32.mrb[2].mxu1 }
 0x183   :  { %v232_v12 = vadd.f32 %v231_v10, %v1542_v32  ;;  %v1138_v13 = vpop.f32.mrb[3].mxu1  ;;  %1161 = vmatmul.mubr.msk.f32.vlgmr.msra.gmra.mrb[6].mxu1 %vm42_vm2, %v240_v5  ;;  %v608_v32 = vld [vmem:[%s1755_s3 + $0x8] sm:$0xff] }
 0x184   :  { %1163 = vmatprep.mubr.msk.f32.mxu1 %vm1378_vm1, %v1379_v7  ;;  %v1330_v34 = vpack.i.bf16 %v608_v32, %v607_v31  ;;  %v1273_v45 = vpack.c.bf16 %v608_v32, %v607_v31 }
 0x185   :  { %v241_v18 = vmul.f32 %v1534_v30, %v232_v12 }
 0x186   :  { %v236_v20 = vpop.f32.mrb[4].mxu1  ;;  %1331 = vrot.lane.b32.xlu0 %v1330_v34, %s1382_s7 }
 0x187   :  { %v237_v21 = vadd.f32 %v236_v20, %v1555_v36  ;;  %1164 = vmatmul.mubr.msk.f32.gmra.mrb[8].mxu1 %vm42_vm2, %v241_v18  ;;  %v1141_v22 = vpop.f32.mrb[5].mxu1  ;;  %v1120_v36 = vpop.f32.mrb[1].mxu0 }
 0x188   :  { %1166 = vmatprep.mubr.msk.f32.mxu1 %vm1378_vm1, %v1379_v7  ;;  %v1647_v37 = vpop.f32.mrb[2].mxu0 }
 0x189   :  { %v242_v26 = vmul.f32 %v1544_v33, %v237_v21  ;;  %v1123_v38 = vpop.f32.mrb[3].mxu0 }
 0x18a   :  { %v128_v39 = vpop.f32.mrb[4].mxu0  ;;  %737 = vrot.lane.b32.xlu0 %v1040_v56, %s1382_s7 }
 0x18b   :  { %1167 = vmatmul.mubr.msk.f32.gmra.mrb[10].mxu1 %vm42_vm2, %v242_v26  ;;  %v129_v40 = vadd.f32 %v1596_v57, %v128_v39  ;;  %v1126_v41 = vpop.f32.mrb[5].mxu0 }
 0x18c   :  { %1202 = vmatprep.mubr.msk.f32.mxu1 %vm1378_vm1, %v1379_v7 }
 0x18d   :  { %v724_v42 = vmax.f32 %v129_v40, 0.0 }
 0x18e   :  { %574 = vrot.lane.b32.xlu0 %v1596_v57, %s1381_s0 }
 0x18f   :  { %726 = vrot.lane.b32.xlu1 %v724_v42, %s1383_s8 }
 0x193   :  { %813 = vrot.lane.b32.xlu1 %v607_v31, %s1384_s11 }
 0x197   :  { %816 = vrot.lane.b32.xlu1 %v1040_v56, %s1384_s11 }
 0x1f8   :  { %v1332_v61 = vpop.permute.xlu0 %1331 }
 0x1f9   :  { %v1334_v5 = vunpack.i.h.bf16 %v1332_v61  ;;  %v1333_v8 = vunpack.i.l.bf16 %v1332_v61 }
 0x1fb   :  { %v1276_v12 = vpack.c.bf16 %v1334_v5, %v1333_v8 }
 0x1fc   :  { %v738_v18 = vpop.permute.xlu0 %737 }
 0x200   :  { %v575_v22 = vpop.permute.xlu0 %574 }
 0x201   :  { %v727_v15 = vpop.permute.xlu1 %726 }
 0x256   :  { %v358_v44 = vpop.f32.mrb[6].mxu1 }
 0x257   :  { %v359_v46 = vadd.f32 %v358_v44, %v281_v43  ;;  %v1162_v47 = vpop.f32.mrb[7].mxu1 }
 0x259   :  { %1188 = vmatmul.mubr.msk.f32.vlgmr.msra.gmra.mrb[6].mxu0 %vm42_vm2, %v359_v46 }
 0x25a   :  { %v363_v48 = vpop.f32.mrb[8].mxu1  ;;  %1190 = vmatprep.mubr.msk.f32.mxu0 %vm1378_vm1, %v1379_v7  ;;  %1274 = vmatpush3.bf16.msra.mxu0 %v1273_v45 }
 0x25b   :  { %v364_v49 = vadd.f32 %v363_v48, %v281_v43  ;;  %v1165_v50 = vpop.f32.mrb[9].mxu1  ;;  %1225 = vmatprep.subr.mxu0 %v1379_v7 }
 0x25d   :  { %1191 = vmatmul.mubr.msk.f32.gmra.mrb[8].mxu0 %vm42_vm2, %v364_v49 }
 0x25e   :  { %v368_v52 = vpop.f32.mrb[10].mxu1  ;;  %1193 = vmatprep.mubr.msk.f32.mxu0 %vm1378_vm1, %v1379_v7 }
 0x25f   :  { %v369_v53 = vadd.f32 %v368_v52, %v281_v43  ;;  %v1168_v54 = vpop.f32.mrb[11].mxu1 }
 0x261   :  { %1194 = vmatmul.mubr.msk.f32.gmra.mrb[10].mxu0 %vm42_vm2, %v369_v53 }
 0x262   :  { %1215 = vmatprep.mubr.msk.f32.mxu0 %vm1378_vm1, %v1379_v7 }
 0x265   :  { %1216 = vmatmul.mubr.msk.f32.vlgmr.msra.gmra.mrb[12].mxu0 %vm618_vm3, %v613_v55 }
 0x266   :  { %1227 = vmatprep.mubr.msk.f32.mxu0 %vm1378_vm1, %v1379_v7 }
 0x32c   :  { %v474_v58 = vpop.f32.mrb[6].mxu0 }
 0x32d   :  { %v1189_v59 = vpop.f32.mrb[7].mxu0  ;;  %v488_v62 = vmul.f32 %v1522_v27, %v474_v58 }
 0x330   :  { %v479_v60 = vpop.f32.mrb[8].mxu0 }
 0x331   :  { %v489_v63 = vmul.f32 %v1534_v30, %v479_v60  ;;  %v1192_v3 = vpop.f32.mrb[9].mxu0 }
 0x333   :  { %v1270_v4 = vpack.c.bf16 %v489_v63, %v488_v62 }
 0x334   :  { %v484_v9 = vpop.f32.mrb[10].mxu0 }
 0x335   :  { %v1195_v10 = vpop.f32.mrb[11].mxu0  ;;  %1271 = vmatpush3.bf16.msra.mxu1 %v1270_v4  ;;  %v490_v11 = vmul.f32 %v1544_v33, %v484_v9 }
 0x336   :  { %1200 = vmatprep.subr.mxu1 %v1379_v7 }
 0x338   :  { %v688_v13 = vpop.f32.mrb[12].mxu0 }
 0x339   :  { %1201 = vmatpush3.msra.mxu1 %v490_v11  ;;  %v1217_v14 = vpop.f32.mrb[13].mxu0 }
 0x33a   :  { %1203 = vmatmul.mubr.msk.f32.vlgmr.msra.gmra.mrb[12].mxu1 %vm132_vm0, %v1427_v0  ;;  %1275 = vmatprep.subr.bf16.mxu1 %v1377_v6  ;;  %v814_v0 = vpop.permute.xlu1 %813  ;;  %v611_v6 = vld [vmem:[%s1756_s4 + $0x8] sm:$0xff] }
 0x33b   :  { %1205 = vmatprep.mubr.msk.f32.mxu1 %vm1378_vm1, %v1379_v7  ;;  %1277 = vmatpush3.bf16.msra.mxu1 %v1276_v12  ;;  %v718_v16 = vmul.f32 0.1, %v611_v6 }
 0x33c   :  { %1226 = vmatpush3.msra.mxu0 %v814_v0 }
 0x33d   :  { %720 = vrot.lane.b32.xlu1 %v718_v16, %s1385_s13 }
 0x33e   :  { %1206 = vmatmul.mubr.msk.f32.gmra.mrb[14].mxu1 %vm132_vm0, %v1432_v1  ;;  %v689_v1 = vadd.f32 %v1040_v56, %v688_v13 }
 0x33f   :  { %1208 = vmatprep.mubr.msk.f32.mxu1 %vm1378_vm1, %v1379_v7 }
 0x340   :  { %v693_v17 = vand.u32 2147483647, %v689_v1  ;;  %v692_v59 = vmax.f32 %v689_v1, 0.0  ;;  %v124_v1 = vadd.f32 %v1596_v57, %v1647_v37 }
 0x342   :  { %1209 = vmatmul.mubr.msk.f32.gmra.mrb[16].mxu1 %vm132_vm0, %v1437_v2  ;;  %v694_v2 = vsub.f32 0.0, %v693_v17  ;;  %v705_v17 = vand.u32 2147483647, %v124_v1 }
 0x343   :  { %1222 = vmatprep.mubr.msk.f32.mxu1 %vm1378_vm1, %v1379_v7 }
 0x344   :  { %v695_v20 = vmul.f32 1.442695, %v694_v2 }
 0x346   :  { %1223 = vmatmul.mubr.msk.f32.vlgmr.msra.gmra.mrb[18].mxu1 %vm618_vm3, %v727_v15  ;;  %1341 = vpow2.f32 %v695_v20 }
 0x350   :  { %v1342_v46 = vpop.eup %1341 }
 0x351   :  { %v697_v50 = vadd.f32 1.0, %v1342_v46 }
 0x40d   :  { %v557_v19 = vpop.f32.mrb[12].mxu1 }
 0x40e   :  { %v558_v21 = vadd.f32 %v557_v19, %v488_v62  ;;  %v1204_v7 = vpop.f32.mrb[13].mxu1  ;;  %v610_v62 = vld [vmem:[%s1756_s4] sm:$0xff] }
 0x40f   :  { %v702_v8 = vmul.f32 0.1, %v610_v62  ;;  %v817_v7 = vpop.permute.xlu1 %816 }
 0x410   :  { %v571_v23 = vmul.f32 %v1522_v27, %v558_v21 }
 0x411   :  { %v562_v24 = vpop.f32.mrb[14].mxu1 }
 0x412   :  { %v577_v25 = vadd.f32 %v575_v22, %v571_v23  ;;  %v563_v26 = vadd.f32 %v562_v24, %v489_v63  ;;  %v1207_v28 = vpop.f32.mrb[15].mxu1 }
 0x414   :  { %v583_v29 = vand.u32 2147483647, %v577_v25  ;;  %v572_v31 = vmul.f32 %v1534_v30, %v563_v26  ;;  %v580_v63 = vmax.f32 %v577_v25, 0.0  ;;  %v721_v26 = vpop.permute.xlu1 %720 }
 0x415   :  { %v567_v32 = vpop.f32.mrb[16].mxu1 }
 0x416   :  { %v586_v34 = vsub.f32 0.0, %v583_v29  ;;  %v578_v35 = vadd.f32 %v575_v22, %v572_v31  ;;  %v568_v36 = vadd.f32 %v567_v32, %v490_v11  ;;  %v1210_v38 = vpop.f32.mrb[17].mxu1 }
 0x418   :  { %v589_v39 = vmul.f32 1.442695, %v586_v34  ;;  %v584_v40 = vand.u32 2147483647, %v578_v35  ;;  %v573_v41 = vmul.f32 %v1544_v33, %v568_v36  ;;  %v581_v11 = vmax.f32 %v578_v35, 0.0 }
 0x419   :  { %v808_v42 = vpop.f32.mrb[18].mxu1 }
 0x41a   :  { %1343 = vpow2.f32 %v589_v39  ;;  %v587_v27 = vsub.f32 0.0, %v584_v40  ;;  %v579_v43 = vadd.f32 %v575_v22, %v573_v41  ;;  %v809_v44 = vadd.f32 %v808_v42, %v738_v18  ;;  %v1224_v45 = vpop.f32.mrb[19].mxu1  ;;  %v612_v41 = vld [vmem:[%s1756_s4 + $0x10] sm:$0xff] }
 0x41b   :  { %v706_v18 = vsub.f32 0.0, %v705_v17  ;;  %v704_v22 = vmax.f32 %v124_v1, 0.0 }
 0x41c   :  { %v591_v47 = vmul.f32 1.442695, %v587_v27  ;;  %v585_v48 = vand.u32 2147483647, %v579_v43  ;;  %v812_v30 = vmax.f32 %v809_v44, 0.0  ;;  %v582_v0 = vmax.f32 %v579_v43, 0.0 }
 0x41d   :  { %v707_v2 = vmul.f32 1.442695, %v706_v18  ;;  %v907_v43 = vmul.f32 0.1, %v612_v41 }
 0x41e   :  { %1345 = vpow2.f32 %v591_v47  ;;  %v588_v49 = vsub.f32 0.0, %v585_v48  ;;  %1228 = vmatmul.mubr.msk.f32.vlgmr.msra.gmra.mrb[14].mxu0 %vm819_vm4, %v812_v30 }
 0x420   :  { %v593_v51 = vmul.f32 1.442695, %v588_v49 }
 0x422   :  { %1347 = vpow2.f32 %v593_v51 }
 0x423   :  { %1349 = vlog2.f32 %v697_v50 }
 0x424   :  { %v1344_v52 = vpop.eup %1343 }
 0x425   :  { %v595_v33 = vadd.f32 1.0, %v1344_v52 }
 0x427   :  { %1351 = vlog2.f32 %v595_v33 }
 0x428   :  { %v1346_v53 = vpop.eup %1345 }
 0x429   :  { %v596_v54 = vadd.f32 1.0, %v1346_v53 }
 0x42b   :  { %1353 = vlog2.f32 %v596_v54 }
 0x42c   :  { %v1348_v55 = vpop.eup %1347 }
 0x42d   :  { %v1350_v56 = vpop.eup %1349  ;;  %v597_v58 = vadd.f32 1.0, %v1348_v55 }
 0x42e   :  { %v699_v60 = vmul.f32 0.6931472, %v1350_v56 }
 0x42f   :  { %1355 = vlog2.f32 %v597_v58 }
 0x430   :  { %v700_v4 = vadd.f32 %v699_v60, %v692_v59  ;;  %1357 = vpow2.f32 %v707_v2 }
 0x431   :  { %v1352_v61 = vpop.eup %1351 }
 0x432   :  { %v599_v3 = vmul.f32 0.6931472, %v1352_v61 }
 0x434   :  { %v604_v5 = vadd.f32 %v599_v3, %v580_v63 }
 0x435   :  { %v1354_v9 = vpop.eup %1353 }
 0x436   :  { %v701_v10 = vadd.f32 %v700_v4, %v604_v5  ;;  %v601_v12 = vmul.f32 0.6931472, %v1354_v9 }
 0x438   :  { %v605_v13 = vadd.f32 %v601_v12, %v581_v11  ;;  %v1698_v14 = vadd.f32 %v702_v8, %v701_v10 }
 0x439   :  { %v1356_v15 = vpop.eup %1355 }
 0x43a   :  { %714 = vrot.lane.b32.xlu0 %v605_v13, %s1386_s16  ;;  %v603_v6 = vmul.f32 0.6931472, %v1356_v15  ;;  %914 = vst.msk [vmem:[%s1757_s5] sm:$0xff] %vm913_vm5, %v1698_v14  ;;  %v1358_v19 = vpop.eup %1357  ;;  %v917_v51 = vmul.f32 %v1698_v14, %v1698_v14 }
 0x43b   :  { %v709_v20 = vadd.f32 1.0, %v1358_v19 }
 0x43c   :  { %v606_v16 = vadd.f32 %v603_v6, %v582_v0  ;;  %v918_v52 = vsel %vm913_vm5, %v917_v51, 0.0 }
 0x43d   :  { %1359 = vlog2.f32 %v709_v20 }
 0x43e   :  { %903 = vrot.lane.b32.xlu0 %v606_v16, %s1387_s19 }
 0x447   :  { %v1360_v21 = vpop.eup %1359 }
 0x448   :  { %v711_v23 = vmul.f32 0.6931472, %v1360_v21 }
 0x44a   :  { %v712_v24 = vadd.f32 %v711_v23, %v704_v22 }
 0x4ac   :  { %v715_v25 = vpop.permute.xlu0 %714 }
 0x4ad   :  { %v717_v28 = vadd.f32 %v715_v25, %v712_v24 }
 0x4af   :  { %v1707_v29 = vadd.f32 %v721_v26, %v717_v28 }
 0x4b0   :  { %v904_v45 = vpop.permute.xlu0 %903 }
 0x4b1   :  { %v924_v57 = vmul.f32 %v1707_v29, %v1707_v29 }
 0x4b3   :  { %926 = vrot.lane.b32.xlu1 %v924_v57, %s1388_s20 }
 0x4f1   :  { %v889_v37 = vpop.f32.mrb[14].mxu0 }
 0x4f2   :  { %v890_v31 = vadd.f32 %v889_v37, %v817_v7  ;;  %v1229_v32 = vpop.f32.mrb[15].mxu0 }
 0x4f4   :  { %v894_v34 = vand.u32 2147483647, %v890_v31  ;;  %v893_v42 = vmax.f32 %v890_v31, 0.0 }
 0x4f6   :  { %v895_v35 = vsub.f32 0.0, %v894_v34 }
 0x4f8   :  { %v896_v36 = vmul.f32 1.442695, %v895_v35 }
 0x4fa   :  { %1361 = vpow2.f32 %v896_v36 }
 0x504   :  { %v1362_v38 = vpop.eup %1361 }
 0x505   :  { %v898_v39 = vadd.f32 1.0, %v1362_v38 }
 0x507   :  { %1363 = vlog2.f32 %v898_v39 }
 0x511   :  { %v1364_v40 = vpop.eup %1363 }
 0x512   :  { %v900_v27 = vmul.f32 0.6931472, %v1364_v40 }
 0x514   :  { %v901_v44 = vadd.f32 %v900_v27, %v893_v42 }
 0x516   :  { %v906_v46 = vadd.f32 %v904_v45, %v901_v44 }
 0x518   :  { %v1715_v47 = vadd.f32 %v907_v43, %v906_v46 }
 0x51a   :  { %v935_v48 = vmul.f32 %v1715_v47, %v1715_v47  ;;  %916 = vst.msk [vmem:[%s1757_s5 + $0x10] sm:$0xff] %vm913_vm5, %v1715_v47 }
 0x51c   :  { %v936_v30 = vsel %vm913_vm5, %v935_v48, 0.0 }
 0x51d   :  { %937 = vadd.xlane.f32.xlu0 %v936_v30 }
 0x525   :  { %v927_v49 = vpop.permute.xlu1 %926 }
 0x526   :  { %v929_v50 = vsel %vm913_vm5, %v927_v49, 0.0 }
 0x527   :  { %930 = vadd.xlane.f32.xlu1 %v929_v50 }
 0x52b   :  { %919 = vadd.xlane.f32.xlu1 %v918_v52 }
 0x5aa   :  { %v938_v33 = vpop.xlane.xlu0 %937 }
 0x5ab   :  { %v939_v53 = vmax.f32 %v938_v33, 1e-16 }
 0x5ad   :  { %1365 = vrsqrt.f32 %v939_v53 }
 0x5b4   :  { %v931_v54 = vpop.xlane.xlu1 %930 }
 0x5b5   :  { %v932_v55 = vmax.f32 %v931_v54, 1e-16 }
 0x5b7   :  { %v1366_v56 = vpop.eup %1365  ;;  %1367 = vrsqrt.f32 %v932_v55  ;;  %v1004_v55 = vmul.f32 0.16666667, %v1698_v14 }
 0x5b8   :  { %v941_v58 = vmul.f32 %v1366_v56, %v1715_v47  ;;  %v920_v61 = vpop.xlane.xlu1 %919 }
 0x5b9   :  { %v921_v62 = vmax.f32 %v920_v61, 1e-16 }
 0x5ba   :  { %969 = vrot.lane.b32.xlu0 %v941_v58, %s1385_s13 }
 0x5bb   :  { %1369 = vrsqrt.f32 %v921_v62 }
 0x5c1   :  { %v1368_v59 = vpop.eup %1367 }
 0x5c2   :  { %v934_v60 = vmul.f32 %v1368_v59, %v1707_v29 }
 0x5c4   :  { %943 = vrot.lane.b32.xlu1 %v934_v60, %s1388_s20 }
 0x5c5   :  { %v1370_v63 = vpop.eup %1369 }
 0x5c6   :  { %v923_v3 = vmul.f32 %v1370_v63, %v1698_v14 }
 0x5c8   :  { %v957_v4 = vmul.f32 %v941_v58, %v923_v3 }
 0x5ca   :  { %v958_v5 = vsel %vm913_vm5, %v957_v4, 0.0 }
 0x5e8   :  { %959 = vadd.xlane.f32.xlu1 %v958_v5 }
 0x5f9   :  { %910 = vrot.lane.b32.xlu1 %v1707_v29, %s1388_s20 }
 0x62c   :  { %v970_v8 = vpop.permute.xlu0 %969 }
 0x62d   :  { %v972_v9 = vmul.f32 %v970_v8, %v934_v60 }
 0x62f   :  { %974 = vrot.lane.b32.xlu0 %v972_v9, %s1388_s20 }
 0x636   :  { %v944_v10 = vpop.permute.xlu1 %943 }
 0x637   :  { %v946_v11 = vmul.f32 %v944_v10, %v923_v3 }
 0x639   :  { %v947_v12 = vsel %vm913_vm5, %v946_v11, 0.0 }
 0x64e   :  { %948 = vadd.xlane.f32.xlu0 %v947_v12 }
 0x675   :  { %v960_v13 = vpop.xlane.xlu1 %959 }
 0x676   :  { %v961_v17 = vrot.slane %v960_v13, 4 }
 0x678   :  { %v962_v2 = vadd.f32 %v961_v17, %v960_v13 }
 0x679   :  { %v911_v15 = vpop.permute.xlu1 %910 }
 0x67a   :  { %915 = vst.msk [vmem:[%s1757_s5 + $0x8] sm:$0xff] %vm913_vm5, %v911_v15  ;;  %v963_v20 = vrot.slane %v962_v2, 2 }
 0x67c   :  { %v964_v7 = vadd.f32 %v963_v20, %v962_v2 }
 0x67e   :  { %v965_v25 = vrot.slane %v964_v7, 1 }
 0x680   :  { %v966_v37 = vadd.f32 %v965_v25, %v964_v7 }
 0x682   :  { %v967_v35 = vmul.f32 0.125, %v966_v37 }
 0x6a1   :  { %v975_v0 = vpop.permute.xlu0 %974 }
 0x6a2   :  { %v977_v6 = vsel %vm913_vm5, %v975_v0, 0.0 }
 0x6a3   :  { %978 = vadd.xlane.f32.xlu0 %v977_v6 }
 0x6db   :  { %v949_v16 = vpop.xlane.xlu0 %948 }
 0x6dc   :  { %v950_v1 = vrot.slane %v949_v16, 4 }
 0x6de   :  { %v951_v18 = vadd.f32 %v950_v1, %v949_v16 }
 0x6e0   :  { %v952_v19 = vrot.slane %v951_v18, 2 }
 0x6e2   :  { %v953_v21 = vadd.f32 %v952_v19, %v951_v18 }
 0x6e4   :  { %v954_v23 = vrot.slane %v953_v21, 1 }
 0x6e6   :  { %v955_v28 = vadd.f32 %v954_v23, %v953_v21 }
 0x6e8   :  { %v956_v32 = vmul.f32 0.125, %v955_v28 }
 0x6ea   :  { %v987_v39 = vmax.f32 %v956_v32, %v967_v35 }
 0x730   :  { %v979_v22 = vpop.xlane.xlu0 %978 }
 0x731   :  { %v980_v24 = vrot.slane %v979_v22, 4 }
 0x733   :  { %v981_v26 = vadd.f32 %v980_v24, %v979_v22 }
 0x735   :  { %v982_v57 = vrot.slane %v981_v26, 2 }
 0x737   :  { %v983_v31 = vadd.f32 %v982_v57, %v981_v26 }
 0x739   :  { %v984_v34 = vrot.slane %v983_v31, 1 }
 0x73b   :  { %v985_v36 = vadd.f32 %v984_v34, %v983_v31 }
 0x73d   :  { %v986_v38 = vmul.f32 0.125, %v985_v36 }
 0x73f   :  { %v988_v40 = vmax.f32 %v987_v39, %v986_v38 }
 0x741   :  { %v989_v41 = vmul.f32 0.7, %v988_v40 }
 0x743   :  { %vm990_vm6 = vcmp.gt.f32.partialorder %v956_v32, %v989_v41  ;;  %vm992_vm7 = vcmp.gt.f32.partialorder %v967_v35, %v989_v41 }
 0x744   :  { %v991_v42 = vsel %vm990_vm6, %v956_v32, 0.0  ;;  %v993_v27 = vsel %vm992_vm7, %v967_v35, 0.0 }
 0x745   :  { %v994_v43 = vmul.f32 1.442695, %v991_v42  ;;  %v996_v44 = vmul.f32 1.442695, %v993_v27 }
 0x747   :  { %1371 = vpow2.f32 %v994_v43 }
 0x748   :  { %1373 = vpow2.f32 %v996_v44 }
 0x751   :  { %v1372_v45 = vpop.eup %1371 }
 0x752   :  { %v1374_v46 = vpop.eup %1373 }
 0x753   :  { %v998_v48 = vadd.f32 %v1374_v46, %v1372_v45 }
 0x755   :  { %1375 = vrcp.f32 %v998_v48 }
 0x75f   :  { %v1376_v30 = vpop.eup %1375 }
 0x760   :  { %v1000_v49 = vmul.f32 %v1376_v30, %v1372_v45  ;;  %v1001_v50 = vmul.f32 %v1376_v30, %v1374_v46 }
 0x762   :  { %v1002_v51 = vadd.f32 1.0, %v1000_v49  ;;  %v1003_v53 = vadd.f32 1.0, %v1001_v50 }
 0x764   :  { %v1005_v52 = vmul.f32 0.16666667, %v1002_v51  ;;  %v1012_v54 = vmul.f32 0.16666667, %v1003_v53 }
 0x766   :  { %v1006_v33 = vmul.f32 %v1005_v52, %v1707_v29  ;;  %v1013_v58 = vmul.f32 %v1012_v54, %v1715_v47 }
 0x768   :  { %1008 = vrot.lane.b32.xlu0 %v1006_v33, %s1388_s20 }
 0x7da   :  { %v1009_v56 = vpop.permute.xlu0 %1008 }
 0x7db   :  { %v1011_v59 = vadd.f32 %v1009_v56, %v1004_v55 }
 0x7dd   :  { %v1014_v60 = vadd.f32 %v1013_v58, %v1011_v59 }
 0x7df   :  { %1015 = vst.msk [vmem:[%s1758_s6] sm:$0xff] %vm913_vm5, %v1014_v60 }

</bundles_post_ra>
